<compile_context>
chip_gen: v7x
topology: tpu7x:2x2x1
jax: 0.10.0
libtpu: 0.0.40
codegen_flags: <defaults>
</compile_context>

<pallas_src>
import jax
import jax.numpy as jnp
from jax.experimental import pallas as pl
from jax.experimental.pallas import tpu as pltpu


def qnet_kernel(x_ref, w1_ref, b1_ref, w2_ref, b2_ref, w3_ref, b3_ref, o_ref):
    x = x_ref[...]                                  # [TB, K] f32
    TB, K = x.shape
    H = w1_ref.shape[1]

    # ---- fc1 + ReLU ----
    if K <= 8:
        # Tiny K: a [TB,K]@[K,128] matmul costs a full systolic pass anyway,
        # so do it on the VPU as an unrolled FMA (MXU time drops ~1/3).
        w1 = w1_ref[...]                            # [K, 128]
        h1 = jnp.broadcast_to(b1_ref[...], (TB, H))
        for k in range(K):
            h1 = h1 + x[:, k:k + 1] * w1[k:k + 1, :]
    else:
        h1 = jnp.dot(x.astype(jnp.bfloat16),
                     w1_ref[...].astype(jnp.bfloat16),
                     preferred_element_type=jnp.float32) + b1_ref[...]
    h1 = jnp.maximum(h1, 0.0)                       # [TB, 128] f32

    # ---- fc2 + ReLU (MXU, bf16 in / f32 accumulate) ----
    h2 = jnp.dot(h1.astype(jnp.bfloat16),
                 w2_ref[...].astype(jnp.bfloat16),
                 preferred_element_type=jnp.float32) + b2_ref[...]
    h2 = jnp.maximum(h2, 0.0)                       # [TB, 128] f32

    # ---- fc3 (padded to 128 lane-dense output columns) ----
    out = jnp.dot(h2.astype(jnp.bfloat16),
                  w3_ref[...].astype(jnp.bfloat16),
                  preferred_element_type=jnp.float32) + b3_ref[...]
    o_ref[...] = out.astype(o_ref.dtype)            # [TB, 128]


def qnet_forward(x, params, *, block_b=512):
    """Forward pass of Qnet. x: [B, NN_Size] f32. Returns [B, n_actions] f32."""
    w1, b1, w2, b2, w3, b3 = params
    B, K = x.shape
    H = w1.shape[1]
    n_actions = w3.shape[1]

    # Pad fc3 to a lane-dense (multiple-of-128) output width; slice back later.
    n_pad = ((max(n_actions, 1) + 127) // 128) * 128
    w3p = jnp.zeros((H, n_pad), jnp.float32).at[:, :n_actions].set(w3)
    b3p = jnp.zeros((1, n_pad), jnp.float32).at[:, :n_actions].set(b3)

    # Batch tile: multiple of 8 sublanes, capped at block_b; pad batch to fit.
    assert block_b % 8 == 0
    tb = min(block_b, ((B + 7) // 8) * 8)
    Bp = ((B + tb - 1) // tb) * tb
    xp = x if Bp == B else jnp.pad(x, ((0, Bp - B), (0, 0)))

    grid = (pl.cdiv(Bp, tb),)

    # Weights/biases: whole-array blocks, constant index_map -> VMEM-resident
    # across all grid steps (no re-DMA per batch tile).
    resident = lambda a: pl.BlockSpec(a.shape, lambda i: (0,) * a.ndim)

    out = pl.pallas_call(
        qnet_kernel,
        out_shape=jax.ShapeDtypeStruct((Bp, n_pad), jnp.float32),
        grid=grid,
        in_specs=[
            pl.BlockSpec((tb, K), lambda i: (i, 0)),   # x: tiled over batch
            resident(w1), resident(b1),
            resident(w2), resident(b2),
            resident(w3p), resident(b3p),
        ],
        out_specs=pl.BlockSpec((tb, n_pad), lambda i: (i, 0)),
        compiler_params=pltpu.CompilerParams(
            dimension_semantics=("parallel",),          # megacore on v7x
            vmem_limit_bytes=32 * 1024 * 1024,          # safe on v5e/v6e/v7x
        ),
    )(xp, w1, b1, w2, b2, w3p, b3p)

    return out[:B, :n_actions]


def init_qnet_params(key, nn_size, hidden=128, n_actions=2):
    """Deterministic init mimicking PyTorch nn.Linear default (uniform ±1/sqrt(fan_in))."""
    def linear(key, fan_in, fan_out):
        kw, kb = jax.random.split(key)
        bound = 1.0 / jnp.sqrt(jnp.float32(fan_in))
        w = jax.random.uniform(kw, (fan_in, fan_out), jnp.float32, -bound, bound)
        b = jax.random.uniform(kb, (1, fan_out), jnp.float32, -bound, bound)
        return w, b

    k1, k2, k3 = jax.random.split(key, 3)
    w1, b1 = linear(k1, nn_size, hidden)
    w2, b2 = linear(k2, hidden, hidden)
    w3, b3 = linear(k3, hidden, n_actions)
    return (w1, b1, w2, b2, w3, b3)


def qnet_reference(x, params):
    """Pure-JAX f32 reference for correctness checking."""
    w1, b1, w2, b2, w3, b3 = params
    h1 = jnp.maximum(x @ w1 + b1, 0.0)
    h2 = jnp.maximum(h1 @ w2 + b2, 0.0)
    return h2 @ w3 + b3


if __name__ == "__main__":
    # TODO(synk): sample_action's epsilon-greedy sampling is host-side Python
    # (random.random / argmax on a 2-vector) and is intentionally not a kernel.
    NN_SIZE = 4  # CartPole-style observation size

    key = jax.random.PRNGKey(0)
    kx, kp, kx2 = jax.random.split(key, 3)
    params = init_qnet_params(kp, NN_SIZE)

    # Small demo config matching the original module usage.
    B = 2
    x = jax.random.normal(kx, (B, NN_SIZE), jnp.float32)
    out = jax.block_until_ready(qnet_forward(x, params))
    ref = qnet_reference(x, params)
    assert out.shape == (B, 2)
    assert jnp.allclose(out, ref, atol=5e-2, rtol=5e-2), "mismatch vs reference (B=2)"

    # Larger, non-multiple-of-tile batch to exercise the batch grid + padding.
    B2 = 300
    x2 = jax.random.normal(kx2, (B2, NN_SIZE), jnp.float32)
    out2 = jax.block_until_ready(qnet_forward(x2, params, block_b=128))
    ref2 = qnet_reference(x2, params)
    assert out2.shape == (B2, 2)
    assert jnp.allclose(out2, ref2, atol=5e-2, rtol=5e-2), "mismatch vs reference (B=300)"

    print("KERNEL_OK")
</pallas_src>

<mosaic_0001>
module attributes {stable_mosaic.version = 11 : i64} {
  func.func @qnet_kernel(%arg0: i32, %arg1: memref<8x4xf32, #tpu.memory_space<vmem>>, %arg2: memref<4x128xf32, #tpu.memory_space<vmem>>, %arg3: memref<1x128xf32, #tpu.memory_space<vmem>>, %arg4: memref<128x128xf32, #tpu.memory_space<vmem>>, %arg5: memref<1x128xf32, #tpu.memory_space<vmem>>, %arg6: memref<128x128xf32, #tpu.memory_space<vmem>>, %arg7: memref<1x128xf32, #tpu.memory_space<vmem>>, %arg8: memref<8x128xf32, #tpu.memory_space<vmem>>) attributes {dimension_semantics = [#tpu.dimension_semantics<parallel>], iteration_bounds = array<i64: 1>, scalar_prefetch = 0 : i64, scratch_operands = 0 : i64, tpu.core_type = #tpu.core_type<tc>, window_params = [{transform_indices = @transform_0, window_bounds = array<i64: 8, 4>}, {pipeline_mode = #tpu.pipeline_mode<synchronous>, transform_indices = @transform_1, window_bounds = array<i64: 4, 128>}, {pipeline_mode = #tpu.pipeline_mode<synchronous>, transform_indices = @transform_2, window_bounds = array<i64: 1, 128>}, {pipeline_mode = #tpu.pipeline_mode<synchronous>, transform_indices = @transform_3, window_bounds = array<i64: 128, 128>}, {pipeline_mode = #tpu.pipeline_mode<synchronous>, transform_indices = @transform_4, window_bounds = array<i64: 1, 128>}, {pipeline_mode = #tpu.pipeline_mode<synchronous>, transform_indices = @transform_5, window_bounds = array<i64: 128, 128>}, {pipeline_mode = #tpu.pipeline_mode<synchronous>, transform_indices = @transform_6, window_bounds = array<i64: 1, 128>}, {transform_indices = @transform_7, window_bounds = array<i64: 8, 128>}]} {
    %c0 = arith.constant 0 : index
    %c0_0 = arith.constant 0 : index
    %0 = vector.load %arg1[%c0, %c0_0] : memref<8x4xf32, #tpu.memory_space<vmem>>, vector<8x4xf32>
    %c0_1 = arith.constant 0 : index
    %c0_2 = arith.constant 0 : index
    %1 = vector.load %arg2[%c0_1, %c0_2] : memref<4x128xf32, #tpu.memory_space<vmem>>, vector<4x128xf32>
    %c0_3 = arith.constant 0 : index
    %c0_4 = arith.constant 0 : index
    %2 = vector.load %arg3[%c0_3, %c0_4] : memref<1x128xf32, #tpu.memory_space<vmem>>, vector<1x128xf32>
    %3 = vector.shape_cast %2 : vector<1x128xf32> to vector<1x128xf32>
    %4 = vector.broadcast %3 : vector<1x128xf32> to vector<8x128xf32>
    %5 = vector.extract_strided_slice %0 {offsets = [0, 0], sizes = [8, 1], strides = [1, 1]} : vector<8x4xf32> to vector<8x1xf32>
    %6 = vector.extract_strided_slice %1 {offsets = [0, 0], sizes = [1, 128], strides = [1, 1]} : vector<4x128xf32> to vector<1x128xf32>
    %7 = vector.broadcast %5 : vector<8x1xf32> to vector<8x128xf32>
    %8 = vector.broadcast %6 : vector<1x128xf32> to vector<8x128xf32>
    %9 = arith.mulf %7, %8 : vector<8x128xf32>
    %10 = arith.addf %4, %9 : vector<8x128xf32>
    %11 = vector.extract_strided_slice %0 {offsets = [0, 1], sizes = [8, 1], strides = [1, 1]} : vector<8x4xf32> to vector<8x1xf32>
    %12 = vector.extract_strided_slice %1 {offsets = [1, 0], sizes = [1, 128], strides = [1, 1]} : vector<4x128xf32> to vector<1x128xf32>
    %13 = vector.broadcast %11 : vector<8x1xf32> to vector<8x128xf32>
    %14 = vector.broadcast %12 : vector<1x128xf32> to vector<8x128xf32>
    %15 = arith.mulf %13, %14 : vector<8x128xf32>
    %16 = arith.addf %10, %15 : vector<8x128xf32>
    %17 = vector.extract_strided_slice %0 {offsets = [0, 2], sizes = [8, 1], strides = [1, 1]} : vector<8x4xf32> to vector<8x1xf32>
    %18 = vector.extract_strided_slice %1 {offsets = [2, 0], sizes = [1, 128], strides = [1, 1]} : vector<4x128xf32> to vector<1x128xf32>
    %19 = vector.broadcast %17 : vector<8x1xf32> to vector<8x128xf32>
    %20 = vector.broadcast %18 : vector<1x128xf32> to vector<8x128xf32>
    %21 = arith.mulf %19, %20 : vector<8x128xf32>
    %22 = arith.addf %16, %21 : vector<8x128xf32>
    %23 = vector.extract_strided_slice %0 {offsets = [0, 3], sizes = [8, 1], strides = [1, 1]} : vector<8x4xf32> to vector<8x1xf32>
    %24 = vector.extract_strided_slice %1 {offsets = [3, 0], sizes = [1, 128], strides = [1, 1]} : vector<4x128xf32> to vector<1x128xf32>
    %25 = vector.broadcast %23 : vector<8x1xf32> to vector<8x128xf32>
    %26 = vector.broadcast %24 : vector<1x128xf32> to vector<8x128xf32>
    %27 = arith.mulf %25, %26 : vector<8x128xf32>
    %28 = arith.addf %22, %27 : vector<8x128xf32>
    %cst = arith.constant 0.000000e+00 : f32
    %29 = vector.broadcast %cst : f32 to vector<8x128xf32>
    %30 = arith.maximumf %28, %29 : vector<8x128xf32>
    %31 = arith.truncf %30 : vector<8x128xf32> to vector<8x128xbf16>
    %c0_5 = arith.constant 0 : index
    %c0_6 = arith.constant 0 : index
    %32 = vector.load %arg4[%c0_5, %c0_6] : memref<128x128xf32, #tpu.memory_space<vmem>>, vector<128x128xf32>
    %33 = arith.truncf %32 : vector<128x128xf32> to vector<128x128xbf16>
    %cst_7 = arith.constant dense<0.000000e+00> : vector<8x128xf32>
    %34 = tpu.matmul %31, %33, %cst_7 {dimension_numbers = #tpu.dot_dimension_numbers<[1], [0], [0], [1], [0, 0, 1, 1], [], []>} : vector<8x128xbf16>, vector<128x128xbf16>, vector<8x128xf32> -> vector<8x128xf32>
    %c0_8 = arith.constant 0 : index
    %c0_9 = arith.constant 0 : index
    %35 = vector.load %arg5[%c0_8, %c0_9] : memref<1x128xf32, #tpu.memory_space<vmem>>, vector<1x128xf32>
    %36 = vector.broadcast %35 : vector<1x128xf32> to vector<8x128xf32>
    %37 = arith.addf %34, %36 : vector<8x128xf32>
    %cst_10 = arith.constant 0.000000e+00 : f32
    %38 = vector.broadcast %cst_10 : f32 to vector<8x128xf32>
    %39 = arith.maximumf %37, %38 : vector<8x128xf32>
    %40 = arith.truncf %39 : vector<8x128xf32> to vector<8x128xbf16>
    %c0_11 = arith.constant 0 : index
    %c0_12 = arith.constant 0 : index
    %41 = vector.load %arg6[%c0_11, %c0_12] : memref<128x128xf32, #tpu.memory_space<vmem>>, vector<128x128xf32>
    %42 = arith.truncf %41 : vector<128x128xf32> to vector<128x128xbf16>
    %cst_13 = arith.constant dense<0.000000e+00> : vector<8x128xf32>
    %43 = tpu.matmul %40, %42, %cst_13 {dimension_numbers = #tpu.dot_dimension_numbers<[1], [0], [0], [1], [0, 0, 1, 1], [], []>} : vector<8x128xbf16>, vector<128x128xbf16>, vector<8x128xf32> -> vector<8x128xf32>
    %c0_14 = arith.constant 0 : index
    %c0_15 = arith.constant 0 : index
    %44 = vector.load %arg7[%c0_14, %c0_15] : memref<1x128xf32, #tpu.memory_space<vmem>>, vector<1x128xf32>
    %45 = vector.broadcast %44 : vector<1x128xf32> to vector<8x128xf32>
    %46 = arith.addf %43, %45 : vector<8x128xf32>
    %c0_16 = arith.constant 0 : index
    %c0_17 = arith.constant 0 : index
    %47 = vector.load %arg8[%c0_16, %c0_17] : memref<8x128xf32, #tpu.memory_space<vmem>>, vector<8x128xf32>
    tpu.vector_store %arg8[%c0_16, %c0_17], %46 {strides = array<i32>} : memref<8x128xf32, #tpu.memory_space<vmem>>, vector<8x128xf32>,
    return
  }
  func.func @transform_0(%arg0: i32) -> (i32, i32) {
    %c0_i32 = arith.constant 0 : i32
    %c0_i32_0 = arith.constant 0 : i32
    return %arg0, %c0_i32 : i32, i32
  }
  func.func @transform_1(%arg0: i32) -> (i32, i32) {
    %c0_i32 = arith.constant 0 : i32
    %c0_i32_0 = arith.constant 0 : i32
    %c0_i32_1 = arith.constant 0 : i32
    return %c0_i32, %c0_i32_0 : i32, i32
  }
  func.func @transform_2(%arg0: i32) -> (i32, i32) {
    %c0_i32 = arith.constant 0 : i32
    %c0_i32_0 = arith.constant 0 : i32
    %c0_i32_1 = arith.constant 0 : i32
    return %c0_i32, %c0_i32_0 : i32, i32
  }
  func.func @transform_3(%arg0: i32) -> (i32, i32) {
    %c0_i32 = arith.constant 0 : i32
    %c0_i32_0 = arith.constant 0 : i32
    %c0_i32_1 = arith.constant 0 : i32
    return %c0_i32, %c0_i32_0 : i32, i32
  }
  func.func @transform_4(%arg0: i32) -> (i32, i32) {
    %c0_i32 = arith.constant 0 : i32
    %c0_i32_0 = arith.constant 0 : i32
    %c0_i32_1 = arith.constant 0 : i32
    return %c0_i32, %c0_i32_0 : i32, i32
  }
  func.func @transform_5(%arg0: i32) -> (i32, i32) {
    %c0_i32 = arith.constant 0 : i32
    %c0_i32_0 = arith.constant 0 : i32
    %c0_i32_1 = arith.constant 0 : i32
    return %c0_i32, %c0_i32_0 : i32, i32
  }
  func.func @transform_6(%arg0: i32) -> (i32, i32) {
    %c0_i32 = arith.constant 0 : i32
    %c0_i32_0 = arith.constant 0 : i32
    %c0_i32_1 = arith.constant 0 : i32
    return %c0_i32, %c0_i32_0 : i32, i32
  }
  func.func @transform_7(%arg0: i32) -> (i32, i32) {
    %c0_i32 = arith.constant 0 : i32
    %c0_i32_0 = arith.constant 0 : i32
    return %arg0, %c0_i32 : i32, i32
  }
}

</mosaic_0001>

<bundles_post_ra>
// kernel: tpu_custom_call.1
= control target key start
LH: loop header
LB: loop body
LE: loop exit
PB: predicated region body
PF: predicated region fallthrough
CT: control target
= control target key end

     0   :  { %12 = vsyncpa [#allocation3], 0  ;;  %s538_s0 = inlined_call_operand.vmem [shape: f32[8,4], index: 0, kind: input, shape index: {}]   ;;  %s539_s1 = inlined_call_operand.vmem [shape: f32[4,128], index: 1, kind: input, shape index: {}]   ;;  %s540_s2 = inlined_call_operand.vmem [shape: f32[1,128], index: 2, kind: input, shape index: {}]   ;;  %s541_s3 = inlined_call_operand.hbm [shape: f32[128,128], index: 3, kind: input, shape index: {}]   ;;  %s542_s4 = inlined_call_operand.vmem [shape: f32[1,128], index: 4, kind: input, shape index: {}]   ;;  %s543_s5 = inlined_call_operand.hbm [shape: f32[128,128], index: 5, kind: input, shape index: {}]   ;;  %s544_s6 = inlined_call_operand.vmem [shape: f32[1,128], index: 6, kind: input, shape index: {}]   ;;  %s545_s7 = inlined_call_operand.hbm [shape: f32[8,128], index: 7, kind: output, shape index: {}]  }
   0x1   :  { %13 = vsyncpa [#allocation6], 0 }
   0x2   :  { %14 = vsyncpa [#allocation4], 0  ;;  %s418_s24 = smov [#allocation2]   ;;  %s346_s28 = scalar_lea.hbm %s541_s3, 2048 }
   0x3   :  { %s26_s25 = sshll.u32 %s418_s24, 4  ;;  %p347_p0 = scmp.ne.s32.totalorder %s541_s3, %s346_s28  ;;  %s27_s25 = int_to_ptr.vmem [resolvable:$true] %s26_s25 }
   0x4   :  { %p350_p1 = scmp.lt.u32.totalorder %s346_s28, %s541_s3 }
   0x6   :  { %p352_p2 = pnand %p350_p1, %p347_p0 }
   0x8   :  { %355 = shalt.err (!%p352_p2)
}
   0x9   :  { %s356_s10 = scalar_lea.vmem %s27_s25, 2048  ;;  %p361_p4 = scmp.lt.s32.totalorder %s27_s25, %s27_s25 }
   0xa   :  { %p357_p3 = scmp.ne.s32.totalorder %s27_s25, %s356_s10  ;;  %p362_p5 = scmp.lt.s32.totalorder %s356_s10, %s356_s10 }
   0xc   :  { %p363_p6 = por %p362_p5, %p361_p4 }
   0xe   :  { %p364_p7 = pnand %p363_p6, %p357_p3 }
  0x10   :  { %367 = shalt.err (!%p364_p7)
}
  0x11   :  { %s419_s11 = smov 128   ;;  %s420_s12 = smov 8  }
  0x12   :  { %32 = dma.hbm_to_vmem [thread:$0]  %s541_s3, 2048, %s27_s25, [#allocation3], %s419_s11, %s419_s11, %s420_s12  }
  0x13   :  { %s421_s15 = smov [#allocation5]   ;;  %s368_s19 = scalar_lea.hbm %s543_s5, 2048 }
  0x14   :  { %s40_s16 = sshll.u32 %s421_s15, 4  ;;  %p369_p8 = scmp.ne.s32.totalorder %s543_s5, %s368_s19  ;;  %s41_s16 = int_to_ptr.vmem [resolvable:$true] %s40_s16 }
  0x15   :  { %p372_p9 = scmp.lt.u32.totalorder %s368_s19, %s543_s5 }
  0x17   :  { %p374_p10 = pnand %p372_p9, %p369_p8 }
  0x19   :  { %377 = shalt.err (!%p374_p10)
}
  0x1a   :  { %s378_s24 = scalar_lea.vmem %s41_s16, 2048  ;;  %p383_p12 = scmp.lt.s32.totalorder %s41_s16, %s41_s16 }
  0x1b   :  { %p379_p11 = scmp.ne.s32.totalorder %s41_s16, %s378_s24  ;;  %p384_p13 = scmp.lt.s32.totalorder %s378_s24, %s378_s24 }
  0x1d   :  { %p385_p0 = por %p384_p13, %p383_p12 }
  0x1f   :  { %p386_p1 = pnand %p385_p0, %p379_p11 }
  0x21   :  { %389 = shalt.err (!%p386_p1)
}
  0x22   :  { %46 = dma.hbm_to_vmem [thread:$0]  %s543_s5, 2048, %s41_s16, [#allocation6], %s419_s11, %s419_s11, %s420_s12  }
  0x23   :  { %412 = dma.done.wait [#allocation3], 2048  }
  0x24   :  { %413 = vsyncadd [#allocation3], 4294965248 }
  0x25   :  { %414 = dma.done.wait [#allocation6], 2048  }
  0x26   :  { %415 = vsyncadd [#allocation6], 4294965248  ;;  %v422_v0 = vmov 0   ;;  %v423_v1 = vmov 2   ;;  %v424_v2 = vmov 0.0   ;;  %v56_v3 = vld [vmem:[%s538_s0] sm:$0xff]  ;;  %v70_v48 = vlaneseq }
  0x27   :  { %341 = vset.pattern.permute.xlu0 %v422_v0  ;;  %343 = vset.pattern.permute.xlu1 %v423_v1  ;;  %v108_v4 = vld [vmem:[#allocation2] sm:$0xff]  ;;  %v109_v5 = vld [vmem:[#allocation2 + $0x8] sm:$0xff]  ;;  %v110_v7 = vld [vmem:[#allocation2 + $0x10] sm:$0xff]  ;;  %v425_v12 = vmov 1   ;;  %v426_v13 = vmov 3   ;;  %vm427_vm0 = vmmov 0  }
  0x28   :  { %290 = vmatprep.subr.bf16.mxu0 %v424_v2  ;;  %310 = vmatprep.subr.bf16.mxu1 %v424_v2  ;;  %v124_v6 = vpack.c.bf16 %v109_v5, %v108_v4  ;;  %v111_v8 = vld [vmem:[#allocation2 + $0x18] sm:$0xff]  ;;  %v112_v10 = vld [vmem:[#allocation2 + $0x20] sm:$0xff]  ;;  %v113_v11 = vld [vmem:[#allocation2 + $0x28] sm:$0xff]  ;;  %v71_v49 = vshrl.u32 %v70_v48, 7  ;;  %s428_s9 = smov [#allocation7]  }
  0x29   :  { %67 = vperm.xlu0 %341, %v56_v3   ;;  %87 = vperm.xlu1 %343, %v56_v3   ;;  %v125_v9 = vpack.c.bf16 %v111_v8, %v110_v7  ;;  %v126_v14 = vpack.c.bf16 %v113_v11, %v112_v10  ;;  %v114_v15 = vld [vmem:[#allocation2 + $0x30] sm:$0xff]  ;;  %v115_v16 = vld [vmem:[#allocation2 + $0x38] sm:$0xff]  ;;  %v116_v18 = vld [vmem:[#allocation2 + $0x40] sm:$0xff]  ;;  %s259_s10 = sshll.u32 %s428_s9, 4  ;;  %s260_s10 = int_to_ptr.vmem [resolvable:$true] %s259_s10 }
  0x2a   :  { %291 = vmatpush3.bf16.msra.mxu0 %v124_v6  ;;  %v127_v17 = vpack.c.bf16 %v115_v16, %v114_v15  ;;  %v117_v19 = vld [vmem:[#allocation2 + $0x48] sm:$0xff]  ;;  %v118_v21 = vld [vmem:[#allocation2 + $0x50] sm:$0xff]  ;;  %v119_v22 = vld [vmem:[#allocation2 + $0x58] sm:$0xff]  ;;  %306 = vmatprep.mubr.msk.bf16.mxu0 %vm427_vm0, %v424_v2  ;;  %v72_v50 = vsub.s32 0, %v71_v49  ;;  %v82_v53 = vsub.s32 1, %v71_v49  ;;  %v92_v55 = vsub.s32 2, %v71_v49  ;;  %p395_p3 = scmp.lt.s32.totalorder %s260_s10, %s260_s10 }
  0x2b   :  { %292 = vmatprep.subr.bf16.mxu0 %v424_v2  ;;  %v128_v20 = vpack.c.bf16 %v117_v19, %v116_v18  ;;  %326 = vmatprep.mubr.msk.bf16.mxu1 %vm427_vm0, %v424_v2  ;;  %v181_v23 = vld [vmem:[#allocation5] sm:$0xff]  ;;  %v182_v24 = vld [vmem:[#allocation5 + $0x8] sm:$0xff]  ;;  %v183_v25 = vld [vmem:[#allocation5 + $0x10] sm:$0xff]  ;;  %v129_v26 = vpack.c.bf16 %v119_v22, %v118_v21  ;;  %v102_v57 = vsub.s32 3, %v71_v49 }
  0x2c   :  { %v197_v27 = vpack.c.bf16 %v182_v24, %v181_v23  ;;  %v184_v28 = vld [vmem:[#allocation5 + $0x18] sm:$0xff]  ;;  %v120_v29 = vld [vmem:[#allocation2 + $0x60] sm:$0xff]  ;;  %v121_v30 = vld [vmem:[#allocation2 + $0x68] sm:$0xff] }
  0x2d   :  { %342 = vset.pattern.permute.xlu0 %v425_v12  ;;  %344 = vset.pattern.permute.xlu1 %v426_v13  ;;  %v198_v31 = vpack.c.bf16 %v184_v28, %v183_v25  ;;  %v185_v32 = vld [vmem:[#allocation5 + $0x20] sm:$0xff]  ;;  %v186_v33 = vld [vmem:[#allocation5 + $0x28] sm:$0xff]  ;;  %v130_v34 = vpack.c.bf16 %v121_v30, %v120_v29  ;;  %v122_v35 = vld [vmem:[#allocation2 + $0x70] sm:$0xff] }
  0x2e   :  { %77 = vperm.xlu0 %342, %v56_v3   ;;  %97 = vperm.xlu1 %344, %v56_v3   ;;  %v123_v36 = vld [vmem:[#allocation2 + $0x78] sm:$0xff]  ;;  %v199_v37 = vpack.c.bf16 %v186_v33, %v185_v32  ;;  %v187_v38 = vld [vmem:[#allocation5 + $0x30] sm:$0xff]  ;;  %v189_v42 = vld [vmem:[#allocation5 + $0x40] sm:$0xff] }
  0x2f   :  { %293 = vmatpush3.bf16.msra.mxu0 %v125_v9  ;;  %311 = vmatpush3.bf16.msra.mxu1 %v197_v27  ;;  %v188_v39 = vld [vmem:[#allocation5 + $0x38] sm:$0xff]  ;;  %v131_v40 = vpack.c.bf16 %v123_v36, %v122_v35  ;;  %v190_v43 = vld [vmem:[#allocation5 + $0x48] sm:$0xff]  ;;  %v191_v45 = vld [vmem:[#allocation5 + $0x50] sm:$0xff] }
  0x30   :  { %294 = vmatprep.subr.bf16.mxu0 %v424_v2  ;;  %312 = vmatprep.subr.bf16.mxu1 %v424_v2  ;;  %v200_v41 = vpack.c.bf16 %v188_v39, %v187_v38  ;;  %v201_v44 = vpack.c.bf16 %v190_v43, %v189_v42  ;;  %v192_v46 = vld [vmem:[#allocation5 + $0x58] sm:$0xff]  ;;  %v57_v51 = vld [vmem:[%s539_s1] sm:$0xf]  ;;  %v194_v12 = vld [vmem:[#allocation5 + $0x68] sm:$0xff] }
  0x31   :  { %v202_v47 = vpack.c.bf16 %v192_v46, %v191_v45  ;;  %v73_v52 = vrot.slane %v57_v51, %v72_v50  ;;  %v83_v59 = vrot.slane %v57_v51, %v82_v53  ;;  %v269_v60 = vld [vmem:[%s540_s2] ss:$0 sm:$0xff]  ;;  %v93_v61 = vrot.slane %v57_v51, %v92_v55  ;;  %v196_v15 = vld [vmem:[#allocation5 + $0x78] sm:$0xff] }
  0x32   :  { %345 = vset.pattern.permute.xlu0 %v426_v13  ;;  %v103_v62 = vrot.slane %v57_v51, %v102_v57  ;;  %v193_v11 = vld [vmem:[#allocation5 + $0x60] sm:$0xff] }
  0x33   :  { %295 = vmatpush3.bf16.msra.mxu0 %v126_v14  ;;  %313 = vmatpush3.bf16.msra.mxu1 %v198_v31  ;;  %v203_v13 = vpack.c.bf16 %v194_v12, %v193_v11  ;;  %v195_v14 = vld [vmem:[#allocation5 + $0x70] sm:$0xff] }
  0x34   :  { %296 = vmatprep.subr.bf16.mxu0 %v424_v2  ;;  %314 = vmatprep.subr.bf16.mxu1 %v424_v2  ;;  %v204_v16 = vpack.c.bf16 %v196_v15, %v195_v14 }
  0x37   :  { %297 = vmatpush3.bf16.msra.mxu0 %v127_v17  ;;  %315 = vmatpush3.bf16.msra.mxu1 %v199_v37  ;;  %v270_v17 = vld [vmem:[%s542_s4] ss:$0 sm:$0xff]  ;;  %s390_s4 = scalar_lea.vmem %s260_s10, 128 }
  0x38   :  { %298 = vmatprep.subr.bf16.mxu0 %v424_v2  ;;  %316 = vmatprep.subr.bf16.mxu1 %v424_v2  ;;  %p391_p2 = scmp.ne.s32.totalorder %s260_s10, %s390_s4  ;;  %p396_p4 = scmp.lt.s32.totalorder %s390_s4, %s390_s4 }
  0x3a   :  { %p397_p5 = por %p396_p4, %p395_p3 }
  0x3b   :  { %299 = vmatpush3.bf16.msra.mxu0 %v128_v20  ;;  %317 = vmatpush3.bf16.msra.mxu1 %v200_v41 }
  0x3c   :  { %300 = vmatprep.subr.bf16.mxu0 %v424_v2  ;;  %318 = vmatprep.subr.bf16.mxu1 %v424_v2  ;;  %p398_p6 = pnand %p397_p5, %p391_p2 }
  0x3f   :  { %301 = vmatpush3.bf16.msra.mxu0 %v129_v26  ;;  %319 = vmatpush3.bf16.msra.mxu1 %v201_v44 }
  0x40   :  { %302 = vmatprep.subr.bf16.mxu0 %v424_v2  ;;  %320 = vmatprep.subr.bf16.mxu1 %v424_v2 }
  0x43   :  { %303 = vmatpush3.bf16.msra.mxu0 %v130_v34  ;;  %321 = vmatpush3.bf16.msra.mxu1 %v202_v47 }
  0x44   :  { %304 = vmatprep.subr.bf16.mxu0 %v424_v2  ;;  %322 = vmatprep.subr.bf16.mxu1 %v424_v2 }
  0x47   :  { %305 = vmatpush3.bf16.msra.mxu0 %v131_v40  ;;  %323 = vmatpush3.bf16.msra.mxu1 %v203_v13 }
  0x48   :  { %324 = vmatprep.subr.bf16.mxu1 %v424_v2  ;;  %v271_v2 = vld [vmem:[%s544_s6] ss:$0 sm:$0xff] }
  0x4b   :  { %325 = vmatpush3.bf16.msra.mxu1 %v204_v16 }
  0xa8   :  { %v68_v54 = vpop.permute.xlu0 %67  ;;  %v88_v56 = vpop.permute.xlu1 %87 }
  0xa9   :  { %v74_v58 = vmul.f32 %v73_v52, %v68_v54  ;;  %v94_v4 = vmul.f32 %v93_v61, %v88_v56 }
  0xab   :  { %v75_v1 = vadd.f32 %v269_v60, %v74_v58 }
  0xad   :  { %v78_v63 = vpop.permute.xlu0 %77  ;;  %v98_v0 = vpop.permute.xlu1 %97 }
  0xae   :  { %v84_v3 = vmul.f32 %v83_v59, %v78_v63  ;;  %v104_v6 = vmul.f32 %v103_v62, %v98_v0 }
  0xb0   :  { %v85_v5 = vadd.f32 %v84_v3, %v75_v1 }
  0xb2   :  { %v95_v7 = vadd.f32 %v94_v4, %v85_v5 }
  0xb4   :  { %v105_v8 = vadd.f32 %v104_v6, %v95_v7 }
  0xb6   :  { %v106_v9 = vmax.f32 %v105_v8, 0.0 }
  0xb8   :  { %v107_v10 = vpack.c.bf16 %v106_v9, %v106_v9 }
  0xba   :  { %307 = vmatmul.mubr.bf16.vlgmr.msra.gmra.mrb[0].mxu0 %v107_v10 }
 0x18d   :  { %v173_v18 = vpop.f32.mrb[0].mxu0 }
 0x18e   :  { %v174_v19 = vadd.f32 %v270_v17, %v173_v18  ;;  %v308_v20 = vpop.f32.mrb[1].mxu0 }
 0x18f   :  { %v176_v21 = vpop.f32.mrb[2].mxu0 }
 0x190   :  { %v179_v22 = vmax.f32 %v174_v19, 0.0  ;;  %v309_v23 = vpop.f32.mrb[3].mxu0 }
 0x192   :  { %v180_v24 = vpack.c.bf16 %v179_v22, %v179_v22 }
 0x194   :  { %327 = vmatmul.mubr.bf16.vlgmr.msra.gmra.mrb[0].mxu1 %v180_v24 }
 0x267   :  { %v246_v25 = vpop.f32.mrb[0].mxu1 }
 0x268   :  { %v247_v26 = vadd.f32 %v271_v2, %v246_v25  ;;  %v328_v27 = vpop.f32.mrb[1].mxu1 }
 0x269   :  { %v249_v28 = vpop.f32.mrb[2].mxu1 }
 0x26a   :  { %252 = vst [vmem:[#allocation7] sm:$0xff] %v247_v26  ;;  %v329_v29 = vpop.f32.mrb[3].mxu1 }
 0x26b   :  { %401 = shalt.err (!%p398_p6)
}
 0x26c   :  { %s402_s6 = scalar_lea.hbm %s545_s7, 128 }
 0x26d   :  { %p403_p7 = scmp.ne.s32.totalorder %s545_s7, %s402_s6  ;;  %p406_p8 = scmp.lt.u32.totalorder %s402_s6, %s545_s7 }
 0x26f   :  { %p408_p9 = pnand %p406_p8, %p403_p7 }
 0x271   :  { %411 = shalt.err (!%p408_p9)
}
 0x272   :  { %262 = dma.vmem_to_hbm [thread:$0]  %s260_s10, 128, %s545_s7, [#allocation4]  }
 0x273   :  { %416 = dma.done.wait [#allocation4], 128  }
 0x274   :  { %417 = vsyncadd [#allocation4], 4294967168 }
 0x275   :  { %266 = vsyncpa [#allocation3], 1 }
 0x276   :  { %267 = vsyncpa [#allocation6], 1 }
 0x277   :  { %268 = vsyncpa [#allocation4], 1 }

</bundles_post_ra>
